<compile_context>
chip_gen: v6e
topology: v6e:2x2x1
jax: 0.10.0
libtpu: 0.0.40
codegen_flags: <defaults>
</compile_context>

<pallas_src>
import functools

import jax
import jax.numpy as jnp
from jax.experimental import pallas as pl
from jax.experimental.pallas import tpu as pltpu


def _round_up(x: int, m: int) -> int:
    return (x + m - 1) // m * m


def _mlp_kernel(*refs, n_layers: int):
    """Fused MLP: (x @ W1 + b1) -> ReLU -> ... -> (h @ Wn + bn).

    refs = (x_ref, w1_ref, b1_ref, ..., wn_ref, bn_ref, o_ref).
    Weights arrive in bf16 (MXU-native); bias/epilogue in f32.
    Intermediates never leave VMEM/vregs.
    """
    x_ref = refs[0]
    o_ref = refs[-1]

    h = x_ref[...]  # f32 (TB, Din_pad)
    for li in range(n_layers):
        w_ref = refs[1 + 2 * li]  # bf16 (Din_pad, Dout_pad)
        b_ref = refs[2 + 2 * li]  # f32  (1, Dout_pad)
        y = jnp.dot(h.astype(jnp.bfloat16), w_ref[...],
                    preferred_element_type=jnp.float32)
        y = y + b_ref[...]                      # f32 bias add (broadcast over rows)
        if li != n_layers - 1:
            y = jnp.maximum(y, 0.0)             # f32 ReLU on hidden layers only
        h = y
    o_ref[...] = h.astype(o_ref.dtype)


def mlp_forward(params, x, *, batch_tile: int = 512):
    """Run the whole MLP as a single pallas_call.

    params: list of (W_t, b) with W_t shaped (Din, Dout), b shaped (Dout,).
    x:      (B, Din) float32.

    batch_tile: rows per grid step when B is large. 512 f32 rows is near the
    measured HBM-roofline sweet spot on v5e/v6e; halve it on v7x (64 MiB VMEM)
    if the padded feature dims get large.
    """
    B, Din = x.shape
    n_layers = len(params)

    # True and lane-dense (multiple-of-128) feature dims per layer boundary.
    dims = [Din] + [int(w.shape[1]) for w, _ in params]
    dims_pad = [_round_up(d, 128) for d in dims]

    # Batch tiling: tile must be a multiple of 8 (sublane) and divide padded B.
    b_pad = _round_up(B, 8)
    if b_pad <= batch_tile:
        tb = b_pad
    else:
        tb = _round_up(batch_tile, 8)
        b_pad = _round_up(B, tb)

    # Zero-pad input to (b_pad, Din_pad): padded columns/rows contribute exactly
    # zero to every matmul, so slicing the output back is exact.
    x_p = jnp.zeros((b_pad, dims_pad[0]), jnp.float32).at[:B, :Din].set(
        x.astype(jnp.float32))

    inputs = [x_p]
    in_specs = [pl.BlockSpec((tb, dims_pad[0]), lambda i: (i, 0))]
    for li, (w, b) in enumerate(params):
        di, do = dims_pad[li], dims_pad[li + 1]
        # Weights pre-cast to bf16 (halves weight DMA, MXU-native); zero-padded.
        w_p = jnp.zeros((di, do), jnp.bfloat16).at[:w.shape[0], :w.shape[1]].set(
            w.astype(jnp.bfloat16))
        b_p = jnp.zeros((1, do), jnp.float32).at[0, :b.shape[0]].set(
            b.astype(jnp.float32))
        inputs += [w_p, b_p]
        # index_map -> (0, 0): weights/bias stay VMEM-resident across batch tiles.
        in_specs += [
            pl.BlockSpec((di, do), lambda i: (0, 0)),
            pl.BlockSpec((1, do), lambda i: (0, 0)),
        ]

    dout_pad = dims_pad[-1]
    flops = int(sum(2 * b_pad * dims_pad[l] * dims_pad[l + 1]
                    for l in range(n_layers)))
    bytes_accessed = int(
        x_p.size * x_p.dtype.itemsize
        + sum(a.size * a.dtype.itemsize for a in inputs[1:])
        + b_pad * dout_pad * 4)

    kernel = functools.partial(_mlp_kernel, n_layers=n_layers)
    out_p = pl.pallas_call(
        kernel,
        out_shape=jax.ShapeDtypeStruct((b_pad, dout_pad), jnp.float32),
        grid=(b_pad // tb,),
        in_specs=in_specs,
        out_specs=pl.BlockSpec((tb, dout_pad), lambda i: (i, 0)),
        compiler_params=pltpu.CompilerParams(
            # Batch tiles are independent -> shard across TensorCores on v7x.
            dimension_semantics=("parallel",),
        ),
        cost_estimate=pl.CostEstimate(
            flops=flops, transcendentals=0, bytes_accessed=bytes_accessed),
    )(*inputs)

    # Slice the lane-padded result back to the true (B, Dout).
    return out_p[:B, :dims[-1]]


def init_mlp_params(key, dims):
    """Deterministic init mirroring nn.Linear shapes: W_t (Din, Dout), b (Dout,)."""
    params = []
    for d_in, d_out in zip(dims[:-1], dims[1:]):
        key, kw, kb = jax.random.split(key, 3)
        bound = 1.0 / jnp.sqrt(d_in)
        w_t = jax.random.uniform(kw, (d_in, d_out), jnp.float32, -bound, bound)
        b = jax.random.uniform(kb, (d_out,), jnp.float32, -bound, bound)
        params.append((w_t, b))
    return params


if __name__ == "__main__":
    dims = [32, 64, 16]   # dims[0] = input feature dim, dims[-1] = output dim
    batch = 8

    key = jax.random.PRNGKey(0)
    key, kx = jax.random.split(key)
    x = jax.random.normal(kx, (batch, dims[0]), jnp.float32)

    params = init_mlp_params(key, dims)

    out = mlp_forward(params, x)
    out = jax.block_until_ready(out)

    # Reference in plain JAX with the same bf16-matmul / f32-epilogue precision.
    ref = x
    for li, (w, b) in enumerate(params):
        ref = jnp.dot(ref.astype(jnp.bfloat16), w.astype(jnp.bfloat16),
                      preferred_element_type=jnp.float32) + b
        if li != len(params) - 1:
            ref = jnp.maximum(ref, 0.0)

    assert out.shape == (batch, dims[-1])
    assert jnp.allclose(out, ref, atol=2e-3, rtol=2e-3)

    # Sanity vs. full-f32 math (bf16 matmul introduces only small error here).
    ref32 = x
    for li, (w, b) in enumerate(params):
        ref32 = ref32 @ w + b
        if li != len(params) - 1:
            ref32 = jnp.maximum(ref32, 0.0)
    assert jnp.allclose(out, ref32, atol=5e-2, rtol=5e-2)

    print("KERNEL_OK")
</pallas_src>

<mosaic_0001>
module attributes {stable_mosaic.version = 11 : i64} {
  func.func @_mlp_kernel(%arg0: i32, %arg1: memref<8x128xf32, #tpu.memory_space<vmem>>, %arg2: memref<128x128xbf16, #tpu.memory_space<vmem>>, %arg3: memref<1x128xf32, #tpu.memory_space<vmem>>, %arg4: memref<128x128xbf16, #tpu.memory_space<vmem>>, %arg5: memref<1x128xf32, #tpu.memory_space<vmem>>, %arg6: memref<8x128xf32, #tpu.memory_space<vmem>>) attributes {dimension_semantics = [#tpu.dimension_semantics<parallel>], iteration_bounds = array<i64: 1>, scalar_prefetch = 0 : i64, scratch_operands = 0 : i64, tpu.core_type = #tpu.core_type<tc>, window_params = [{transform_indices = @transform_0, window_bounds = array<i64: 8, 128>}, {pipeline_mode = #tpu.pipeline_mode<synchronous>, transform_indices = @transform_1, window_bounds = array<i64: 128, 128>}, {pipeline_mode = #tpu.pipeline_mode<synchronous>, transform_indices = @transform_2, window_bounds = array<i64: 1, 128>}, {pipeline_mode = #tpu.pipeline_mode<synchronous>, transform_indices = @transform_3, window_bounds = array<i64: 128, 128>}, {pipeline_mode = #tpu.pipeline_mode<synchronous>, transform_indices = @transform_4, window_bounds = array<i64: 1, 128>}, {transform_indices = @transform_5, window_bounds = array<i64: 8, 128>}]} {
    %c0 = arith.constant 0 : index
    %c0_0 = arith.constant 0 : index
    %0 = vector.load %arg1[%c0, %c0_0] : memref<8x128xf32, #tpu.memory_space<vmem>>, vector<8x128xf32>
    %1 = arith.truncf %0 : vector<8x128xf32> to vector<8x128xbf16>
    %c0_1 = arith.constant 0 : index
    %c0_2 = arith.constant 0 : index
    %2 = vector.load %arg2[%c0_1, %c0_2] : memref<128x128xbf16, #tpu.memory_space<vmem>>, vector<128x128xbf16>
    %cst = arith.constant dense<0.000000e+00> : vector<8x128xf32>
    %3 = tpu.matmul %1, %2, %cst {dimension_numbers = #tpu.dot_dimension_numbers<[1], [0], [0], [1], [0, 0, 1, 1], [], []>} : vector<8x128xbf16>, vector<128x128xbf16>, vector<8x128xf32> -> vector<8x128xf32>
    %c0_3 = arith.constant 0 : index
    %c0_4 = arith.constant 0 : index
    %4 = vector.load %arg3[%c0_3, %c0_4] : memref<1x128xf32, #tpu.memory_space<vmem>>, vector<1x128xf32>
    %5 = vector.broadcast %4 : vector<1x128xf32> to vector<8x128xf32>
    %6 = arith.addf %3, %5 : vector<8x128xf32>
    %cst_5 = arith.constant 0.000000e+00 : f32
    %7 = vector.broadcast %cst_5 : f32 to vector<8x128xf32>
    %8 = arith.maximumf %6, %7 : vector<8x128xf32>
    %9 = arith.truncf %8 : vector<8x128xf32> to vector<8x128xbf16>
    %c0_6 = arith.constant 0 : index
    %c0_7 = arith.constant 0 : index
    %10 = vector.load %arg4[%c0_6, %c0_7] : memref<128x128xbf16, #tpu.memory_space<vmem>>, vector<128x128xbf16>
    %cst_8 = arith.constant dense<0.000000e+00> : vector<8x128xf32>
    %11 = tpu.matmul %9, %10, %cst_8 {dimension_numbers = #tpu.dot_dimension_numbers<[1], [0], [0], [1], [0, 0, 1, 1], [], []>} : vector<8x128xbf16>, vector<128x128xbf16>, vector<8x128xf32> -> vector<8x128xf32>
    %c0_9 = arith.constant 0 : index
    %c0_10 = arith.constant 0 : index
    %12 = vector.load %arg5[%c0_9, %c0_10] : memref<1x128xf32, #tpu.memory_space<vmem>>, vector<1x128xf32>
    %13 = vector.broadcast %12 : vector<1x128xf32> to vector<8x128xf32>
    %14 = arith.addf %11, %13 : vector<8x128xf32>
    %c0_11 = arith.constant 0 : index
    %c0_12 = arith.constant 0 : index
    %15 = vector.load %arg6[%c0_11, %c0_12] : memref<8x128xf32, #tpu.memory_space<vmem>>, vector<8x128xf32>
    tpu.vector_store %arg6[%c0_11, %c0_12], %14 {strides = array<i32>} : memref<8x128xf32, #tpu.memory_space<vmem>>, vector<8x128xf32>,
    return
  }
  func.func @transform_0(%arg0: i32) -> (i32, i32) {
    %c0_i32 = arith.constant 0 : i32
    %c0_i32_0 = arith.constant 0 : i32
    return %arg0, %c0_i32 : i32, i32
  }
  func.func @transform_1(%arg0: i32) -> (i32, i32) {
    %c0_i32 = arith.constant 0 : i32
    %c0_i32_0 = arith.constant 0 : i32
    %c0_i32_1 = arith.constant 0 : i32
    return %c0_i32, %c0_i32_0 : i32, i32
  }
  func.func @transform_2(%arg0: i32) -> (i32, i32) {
    %c0_i32 = arith.constant 0 : i32
    %c0_i32_0 = arith.constant 0 : i32
    %c0_i32_1 = arith.constant 0 : i32
    return %c0_i32, %c0_i32_0 : i32, i32
  }
  func.func @transform_3(%arg0: i32) -> (i32, i32) {
    %c0_i32 = arith.constant 0 : i32
    %c0_i32_0 = arith.constant 0 : i32
    %c0_i32_1 = arith.constant 0 : i32
    return %c0_i32, %c0_i32_0 : i32, i32
  }
  func.func @transform_4(%arg0: i32) -> (i32, i32) {
    %c0_i32 = arith.constant 0 : i32
    %c0_i32_0 = arith.constant 0 : i32
    %c0_i32_1 = arith.constant 0 : i32
    return %c0_i32, %c0_i32_0 : i32, i32
  }
  func.func @transform_5(%arg0: i32) -> (i32, i32) {
    %c0_i32 = arith.constant 0 : i32
    %c0_i32_0 = arith.constant 0 : i32
    return %arg0, %c0_i32 : i32, i32
  }
}

</mosaic_0001>

<bundles_post_ra>
// kernel: tpu_custom_call.1
= control target key start
LH: loop header
LB: loop body
LE: loop exit
PB: predicated region body
PF: predicated region fallthrough
CT: control target
= control target key end

     0   :  { %10 = vsyncpa [#allocation3], 0  ;;  %s546_s0 = inlined_call_operand.hbm [shape: f32[8,128], index: 0, kind: input, shape index: {}]   ;;  %s547_s1 = inlined_call_operand.hbm [shape: bf16[128,128], index: 1, kind: input, shape index: {}]   ;;  %s548_s2 = inlined_call_operand.vmem [shape: f32[1,128], index: 2, kind: input, shape index: {}]   ;;  %s549_s3 = inlined_call_operand.hbm [shape: bf16[128,128], index: 3, kind: input, shape index: {}]   ;;  %s550_s4 = inlined_call_operand.vmem [shape: f32[1,128], index: 4, kind: input, shape index: {}]   ;;  %s551_s5 = inlined_call_operand.hbm [shape: f32[8,128], index: 5, kind: output, shape index: {}]  }
   0x1   :  { %11 = vsyncpa [#allocation6], 0 }
   0x2   :  { %12 = vsyncpa [#allocation4], 0  ;;  %s490_s18 = smov [#allocation5]  }
   0x3   :  { %s28_s19 = sshll.u32 %s490_s18, 4  ;;  %s29_s19 = int_to_ptr.vmem [resolvable:$true] %s28_s19 }
   0x4   :  { %s412_s20 = scalar_lea.vmem %s29_s19, 1024  ;;  %p417_p1 = scmp.lt.s32.totalorder %s29_s19, %s29_s19 }
   0x5   :  { %p413_p0 = scmp.ne.s32.totalorder %s29_s19, %s412_s20  ;;  %p418_p2 = scmp.lt.s32.totalorder %s412_s20, %s412_s20 }
   0x7   :  { %p419_p3 = por %p418_p2, %p417_p1 }
   0x9   :  { %p420_p4 = pnand %p419_p3, %p413_p0 }
   0xb   :  { %423 = shalt.err (!%p420_p4)
}
   0xc   :  { %s491_s21 = smov 64   ;;  %s492_s22 = smov 4  }
   0xd   :  { %34 = dma.hbm_to_vmem [thread:$0]  %s547_s1, 1024, %s29_s19, [#allocation6], %s491_s21, %s491_s21, %s492_s22  }
   0xe   :  { %s493_s25 = smov [#allocation2]   ;;  %s494_s27 = smov [#allocation7]  }
   0xf   :  { %s19_s26 = sshll.u32 %s493_s25, 4  ;;  %s42_s28 = sshll.u32 %s494_s27, 4  ;;  %s20_s26 = int_to_ptr.vmem [resolvable:$true] %s19_s26  ;;  %s43_s28 = int_to_ptr.vmem [resolvable:$true] %s42_s28 }
  0x10   :  { %s432_s29 = scalar_lea.vmem %s20_s26, 128  ;;  %p437_p6 = scmp.lt.s32.totalorder %s20_s26, %s20_s26 }
  0x11   :  { %p433_p5 = scmp.ne.s32.totalorder %s20_s26, %s432_s29  ;;  %p438_p7 = scmp.lt.s32.totalorder %s432_s29, %s432_s29 }
  0x13   :  { %p439_p8 = por %p438_p7, %p437_p6 }
  0x15   :  { %p440_p9 = pnand %p439_p8, %p433_p5 }
  0x17   :  { %443 = shalt.err (!%p440_p9)
}
  0x18   :  { %22 = dma.hbm_to_vmem [thread:$0]  %s546_s0, 128, %s20_s26, [#allocation3]  }
  0x19   :  { %s452_s7 = scalar_lea.vmem %s43_s28, 1024  ;;  %p457_p11 = scmp.lt.s32.totalorder %s43_s28, %s43_s28 }
  0x1a   :  { %p453_p10 = scmp.ne.s32.totalorder %s43_s28, %s452_s7  ;;  %p458_p12 = scmp.lt.s32.totalorder %s452_s7, %s452_s7 }
  0x1c   :  { %p459_p13 = por %p458_p12, %p457_p11 }
  0x1e   :  { %p460_p0 = pnand %p459_p13, %p453_p10 }
  0x20   :  { %463 = shalt.err (!%p460_p0)
}
  0x21   :  { %48 = dma.hbm_to_vmem [thread:$0]  %s549_s3, 1024, %s43_s28, [#allocation6], %s491_s21, %s491_s21, %s492_s22  }
  0x22   :  { %484 = dma.done.wait [#allocation3], 128  }
  0x23   :  { %485 = vsyncadd [#allocation3], 4294967168 }
  0x24   :  { %486 = dma.done.wait [#allocation6], 2048  }
  0x25   :  { %487 = vsyncadd [#allocation6], 4294965248  ;;  %v495_v0 = vmov 0.0   ;;  %vm496_vm0 = vmmov 0   ;;  %v388_v1 = vld [vmem:[#allocation5 + $0x38] sm:$0xff]   ;;  %v389_v2 = vld [vmem:[#allocation5 + $0x30] sm:$0xff]  }
  0x26   :  { %340 = vmatprep.subr.bf16.mxu0 %v495_v0  ;;  %356 = vmatprep.mubr.msk.bf16.mxu0 %vm496_vm0, %v495_v0  ;;  %v390_v3 = vld [vmem:[#allocation5 + $0x28] sm:$0xff]   ;;  %v396_v4 = vld [vmem:[#allocation7 + $0x38] sm:$0xff]   ;;  %v391_v5 = vld [vmem:[#allocation5 + $0x20] sm:$0xff]   ;;  %s497_s11 = smov [#allocation8]  }
  0x27   :  { %360 = vmatprep.subr.bf16.mxu1 %v495_v0  ;;  %376 = vmatprep.mubr.msk.bf16.mxu1 %vm496_vm0, %v495_v0  ;;  %v397_v6 = vld [vmem:[#allocation7 + $0x30] sm:$0xff]   ;;  %v392_v7 = vld [vmem:[#allocation5 + $0x18] sm:$0xff]   ;;  %v398_v8 = vld [vmem:[#allocation7 + $0x28] sm:$0xff]   ;;  %s294_s12 = sshll.u32 %s497_s11, 4  ;;  %s295_s12 = int_to_ptr.vmem [resolvable:$true] %s294_s12 }
  0x28   :  { %341 = vmatpush3.bf16.msra.mxu0 %v388_v1  ;;  %361 = vmatpush3.bf16.msra.mxu1 %v396_v4  ;;  %v393_v9 = vld [vmem:[#allocation5 + $0x10] sm:$0xff]   ;;  %v399_v10 = vld [vmem:[#allocation7 + $0x20] sm:$0xff]   ;;  %v394_v11 = vld [vmem:[#allocation5 + $0x8] sm:$0xff]   ;;  %p469_p2 = scmp.lt.s32.totalorder %s295_s12, %s295_s12 }
  0x29   :  { %342 = vmatprep.subr.bf16.mxu0 %v495_v0  ;;  %362 = vmatprep.subr.bf16.mxu1 %v495_v0  ;;  %v400_v12 = vld [vmem:[#allocation7 + $0x18] sm:$0xff]   ;;  %v395_v13 = vld [vmem:[#allocation5] sm:$0xff]   ;;  %v401_v15 = vld [vmem:[#allocation7 + $0x10] sm:$0xff]  }
  0x2a   :  { %v61_v14 = vld [vmem:[#allocation2] sm:$0xff]  ;;  %v402_v17 = vld [vmem:[#allocation7 + $0x8] sm:$0xff]   ;;  %v403_v18 = vld [vmem:[#allocation7] sm:$0xff]  }
  0x2b   :  { %v62_v16 = vpack.c.bf16 %v61_v14, %v61_v14  ;;  %v304_v19 = vld [vmem:[%s548_s2] ss:$0 sm:$0xff]  ;;  %s464_s2 = scalar_lea.vmem %s295_s12, 128 }
  0x2c   :  { %343 = vmatpush3.bf16.msra.mxu0 %v389_v2  ;;  %363 = vmatpush3.bf16.msra.mxu1 %v397_v6  ;;  %v313_v27 = vld [vmem:[%s550_s4] ss:$0 sm:$0xff]  ;;  %p465_p1 = scmp.ne.s32.totalorder %s295_s12, %s464_s2  ;;  %p470_p3 = scmp.lt.s32.totalorder %s464_s2, %s464_s2 }
  0x2d   :  { %344 = vmatprep.subr.bf16.mxu0 %v495_v0  ;;  %364 = vmatprep.subr.bf16.mxu1 %v495_v0 }
  0x2e   :  { %p471_p4 = por %p470_p3, %p469_p2 }
  0x30   :  { %345 = vmatpush3.bf16.msra.mxu0 %v390_v3  ;;  %365 = vmatpush3.bf16.msra.mxu1 %v398_v8  ;;  %p472_p5 = pnand %p471_p4, %p465_p1 }
  0x31   :  { %346 = vmatprep.subr.bf16.mxu0 %v495_v0  ;;  %366 = vmatprep.subr.bf16.mxu1 %v495_v0 }
  0x34   :  { %347 = vmatpush3.bf16.msra.mxu0 %v391_v5  ;;  %367 = vmatpush3.bf16.msra.mxu1 %v399_v10 }
  0x35   :  { %348 = vmatprep.subr.bf16.mxu0 %v495_v0  ;;  %368 = vmatprep.subr.bf16.mxu1 %v495_v0 }
  0x38   :  { %349 = vmatpush3.bf16.msra.mxu0 %v392_v7  ;;  %369 = vmatpush3.bf16.msra.mxu1 %v400_v12 }
  0x39   :  { %350 = vmatprep.subr.bf16.mxu0 %v495_v0  ;;  %370 = vmatprep.subr.bf16.mxu1 %v495_v0 }
  0x3c   :  { %351 = vmatpush3.bf16.msra.mxu0 %v393_v9  ;;  %371 = vmatpush3.bf16.msra.mxu1 %v401_v15 }
  0x3d   :  { %352 = vmatprep.subr.bf16.mxu0 %v495_v0  ;;  %372 = vmatprep.subr.bf16.mxu1 %v495_v0 }
  0x40   :  { %353 = vmatpush3.bf16.msra.mxu0 %v394_v11  ;;  %373 = vmatpush3.bf16.msra.mxu1 %v402_v17 }
  0x41   :  { %354 = vmatprep.subr.bf16.mxu0 %v495_v0  ;;  %374 = vmatprep.subr.bf16.mxu1 %v495_v0 }
  0x44   :  { %355 = vmatpush3.bf16.msra.mxu0 %v395_v13  ;;  %375 = vmatpush3.bf16.msra.mxu1 %v403_v18 }
  0x47   :  { %357 = vmatmul.mubr.bf16.vlgmr.msra.gmra.mxu0 %v62_v16 }
 0x107   :  { %v168_v20 = vpop.f32.mrf.mxu0 }
 0x108   :  { %v169_v21 = vadd.f32 %v304_v19, %v168_v20 }
 0x109   :  { %v358_v22 = vpop.f32.mrf.mxu0 }
 0x10a   :  { %v174_v23 = vmax.f32 %v169_v21, 0.0 }
 0x10b   :  { %v171_v24 = vpop.f32.mrf.mxu0 }
 0x10c   :  { %v175_v25 = vpack.c.bf16 %v174_v23, %v174_v23 }
 0x10d   :  { %v359_v26 = vpop.f32.mrf.mxu0 }
 0x10e   :  { %377 = vmatmul.mubr.bf16.vlgmr.msra.gmra.mxu1 %v175_v25 }
 0x1ce   :  { %v281_v28 = vpop.f32.mrf.mxu1 }
 0x1cf   :  { %v282_v29 = vadd.f32 %v313_v27, %v281_v28 }
 0x1d0   :  { %v378_v30 = vpop.f32.mrf.mxu1 }
 0x1d1   :  { %287 = vst [vmem:[#allocation8] sm:$0xff] %v282_v29 }
 0x1d2   :  { %v284_v31 = vpop.f32.mrf.mxu1 }
 0x1d3   :  { %475 = shalt.err (!%p472_p5)
}
 0x1d4   :  { %297 = dma.vmem_to_hbm [thread:$0]  %s295_s12, 128, %s551_s5, [#allocation4]   ;;  %v379_v32 = vpop.f32.mrf.mxu1 }
 0x1d5   :  { %488 = dma.done.wait [#allocation4], 128  }
 0x1d6   :  { %489 = vsyncadd [#allocation4], 4294967168 }
 0x1d7   :  { %301 = vsyncpa [#allocation3], 1 }
 0x1d8   :  { %302 = vsyncpa [#allocation6], 1 }
 0x1d9   :  { %303 = vsyncpa [#allocation4], 1 }

</bundles_post_ra>
